<compile_context>
chip_gen: v7x
topology: tpu7x:2x2x1
jax: 0.10.0
libtpu: 0.0.40
codegen_flags: <defaults>
</compile_context>

<pallas_src>
import functools

import jax
import jax.numpy as jnp
from jax.experimental import pallas as pl
from jax.experimental.pallas import tpu as pltpu


def _round_up(x, m):
    return ((x + m - 1) // m) * m


def _vmem_capacity_bytes():
    """Physical VMEM of the local TPU (128 MiB v5e/v6e, 64 MiB v7x per core)."""
    try:
        info = pltpu.get_tpu_info()
        cap = getattr(info, "vmem_capacity_bytes", None)
        if cap:
            return int(cap)
    except Exception:
        pass
    return 128 * 2**20


def _temporal_block_kernel(x_ref, w1_ref, b1_ref, w2_ref, b2_ref, *rest,
                           K, dil, pad, pad_buf, L, B_t, has_downsample):
    """One grid step processes B_t batch elements.

    x_ref  : (B_t, pad_buf + L, C_in_p)   bf16, left-padded (zeros), channel-padded
    w1_ref : (K, C_in_p, C_h_p)           bf16 per-tap conv1 weight
    b1_ref : (1, C_h_p)                   f32
    w2_ref : (K, C_h_p, C_out_p)          bf16 per-tap conv2 weight
    b2_ref : (1, C_out_p)                 f32
    [wd_ref: (C_in_p, C_out_p) bf16, bd_ref: (1, C_out_p) f32]  (only if downsample)
    out_ref: (B_t, L, C_out_p)            bf16
    h_ref  : VMEM scratch (B_t, pad_buf + L, C_h_p) bf16
    """
    if has_downsample:
        wd_ref, bd_ref, out_ref, h_ref = rest
    else:
        out_ref, h_ref = rest

    C_in_p = x_ref.shape[-1]
    C_h_p = h_ref.shape[-1]
    C_out_p = out_ref.shape[-1]
    off = pad_buf - pad  # static sublane-alignment offset, >= 0

    # Zero the left-pad rows of the hidden scratch ONCE: the scratch persists
    # across grid steps, valid rows [pad_buf, pad_buf+L) are fully overwritten
    # every step, and the padded channel columns come out of conv1 as
    # relu(0) = 0 on their own.
    if pad_buf > 0:
        @pl.when(pl.program_id(0) == 0)
        def _():
            h_ref[:, pl.ds(0, pad_buf), :] = jnp.zeros(
                (B_t, pad_buf, C_h_p), h_ref.dtype)

    # ---- conv1: K accumulating MXU matmuls (128-lane contraction each) ------
    acc1 = None
    for j in range(K):
        xj = x_ref[:, pl.ds(off + j * dil, L), :].reshape(B_t * L, C_in_p)
        pj = jnp.dot(xj, w1_ref[j], preferred_element_type=jnp.float32)
        acc1 = pj if acc1 is None else acc1 + pj
    h = jnp.maximum(acc1 + b1_ref[...], 0.0)                 # bias+ReLU in f32
    # dropout1: identity (inference mode)
    h_ref[:, pl.ds(pad_buf, L), :] = h.reshape(B_t, L, C_h_p).astype(h_ref.dtype)

    # ---- conv2: K accumulating MXU matmuls -----------------------------------
    acc2 = None
    for j in range(K):
        hj = h_ref[:, pl.ds(off + j * dil, L), :].reshape(B_t * L, C_h_p)
        pj = jnp.dot(hj, w2_ref[j], preferred_element_type=jnp.float32)
        acc2 = pj if acc2 is None else acc2 + pj
    out = jnp.maximum(acc2 + b2_ref[...], 0.0)
    # dropout2: identity (inference mode)

    # ---- residual + final ReLU ------------------------------------------------
    x_res = x_ref[:, pl.ds(pad_buf, L), :].reshape(B_t * L, C_in_p)
    if has_downsample:
        res = jnp.dot(x_res, wd_ref[...], preferred_element_type=jnp.float32)
        res = res + bd_ref[...]
    else:
        # n_inputs == n_outputs: identity residual.
        # TODO(synk): this adds the bf16-rounded (channel-padded) x, not the f32
        # input; keep an f32 residual operand if closer parity is required.
        res = x_res.astype(jnp.float32)

    out_ref[...] = jnp.maximum(out + res, 0.0).reshape(
        B_t, L, C_out_p).astype(out_ref.dtype)


def temporal_block_pallas(x_ncl, params, *, kernel_size, dilation, padding,
                          batch_tile=None):
    """x_ncl: (N, C_in, L) float32 (PyTorch NCW layout). Returns (N, C_out, L)."""
    N, C_in, L = x_ncl.shape
    K, dil, pad = kernel_size, dilation, padding

    # ---- effective (weight-normalized) conv weights, in f32 -----------------
    def wn(v, g):  # v: (O, I, K), g: (O,)
        nrm = jnp.sqrt(jnp.sum(v * v, axis=(1, 2), keepdims=True))
        return g.reshape(-1, 1, 1) * v / nrm

    w1_eff = wn(params["v1"].astype(jnp.float32), params["g1"].astype(jnp.float32))
    w2_eff = wn(params["v2"].astype(jnp.float32), params["g2"].astype(jnp.float32))
    C_h, C_out = w1_eff.shape[0], w2_eff.shape[0]

    LANE = 128
    C_in_p = _round_up(C_in, LANE)
    C_h_p = _round_up(C_h, LANE)
    C_out_p = _round_up(C_out, LANE)
    # bf16 packs 16 rows per vreg: align the causal left pad to 16 sublanes so
    # the hidden writeback / residual read start on a packed-sublane boundary.
    pad_buf = _round_up(pad, 16) if pad > 0 else 0

    # (O, I, K) -> per-tap (K, I_pad, O_pad), bf16 for the MXU.
    # TODO(synk): when K*C_in <= 128, taps could be packed at C_in granularity
    # (im2col in the wrapper) to cut MXU passes ~K-fold for tiny channel counts.
    def pack_conv_w(w_eff, I, I_p, O, O_p):
        w = jnp.transpose(w_eff, (2, 1, 0))                           # (K, I, O)
        w = jnp.zeros((K, I_p, O_p), jnp.float32).at[:, :I, :O].set(w)
        return w.astype(jnp.bfloat16)

    w1 = pack_conv_w(w1_eff, C_in, C_in_p, C_h, C_h_p)
    w2 = pack_conv_w(w2_eff, C_h, C_h_p, C_out, C_out_p)
    b1 = jnp.zeros((1, C_h_p), jnp.float32).at[0, :C_h].set(
        params["b1"].astype(jnp.float32))
    b2 = jnp.zeros((1, C_out_p), jnp.float32).at[0, :C_out].set(
        params["b2"].astype(jnp.float32))

    has_downsample = params.get("wd") is not None
    if not has_downsample:
        assert C_in == C_out, "identity residual requires n_inputs == n_outputs"

    # ---- input layout: NCW -> NLC, left time pad, channel pad, bf16 ---------
    # (single fused XLA pass)
    # TODO(synk): for a full TCN stack, materialize this padded bf16 NLC layout
    # once and reuse it across all TemporalBlocks (and for production L, tile
    # the time axis with a pad-sized halo) instead of re-laying out per block.
    x_nlc = jnp.transpose(x_ncl, (0, 2, 1)).astype(jnp.float32)       # (N, L, C_in)
    x_pad = jnp.pad(x_nlc, ((0, 0), (pad_buf, 0), (0, C_in_p - C_in))
                    ).astype(jnp.bfloat16)                            # (N, pad_buf+L, C_in_p)

    # ---- generation-aware VMEM budget & batch tile ---------------------------
    vmem_cap = _vmem_capacity_bytes()        # 128 MiB v5e/v6e, 64 MiB v7x
    budget = vmem_cap // 4                   # per-step working-set target

    # Fixed (batch-independent) bytes: weights/biases, double-buffered by Pallas.
    fixed_bytes = 2 * (w1.size * 2 + w2.size * 2 + (C_h_p + C_out_p) * 4)
    if has_downsample:
        fixed_bytes += 2 * (C_in_p * C_out_p * 2 + C_out_p * 4)

    # Per-batch-element bytes: pipelined blocks, scratch, and f32 accumulators.
    per_elem = (2 * (pad_buf + L) * C_in_p * 2        # x block (bf16, 2 bufs)
                + 2 * L * C_out_p * 2                 # out block (bf16, 2 bufs)
                + (pad_buf + L) * C_h_p * 2           # hidden scratch (bf16)
                + L * C_h_p * 4                       # conv1 f32 accumulator
                + 2 * L * C_out_p * 4                 # conv2 acc + residual (f32)
                + L * max(C_in_p, C_h_p) * 2)         # live per-tap bf16 slice

    if batch_tile is None:
        # Cap B_t at N//2 so the grid has >= 2 steps and "parallel" semantics
        # can shard across v7x's 2 TensorCores (costs one extra ~0.35us step on
        # single-TC chips).
        cap_bt = max(1, N // 2)
        batch_tile = 1
        for d in range(1, N + 1):
            if N % d == 0 and d <= cap_bt and fixed_bytes + d * per_elem <= budget:
                batch_tile = d
    B_t = batch_tile
    assert N % B_t == 0, "batch_tile must divide N"
    grid = (N // B_t,)

    need = fixed_bytes + B_t * per_elem
    vmem_limit = int(min(max(2 * need, 32 * 2**20), (3 * vmem_cap) // 4))

    # ---- operands / specs -----------------------------------------------------
    in_specs = [
        pl.BlockSpec((B_t, pad_buf + L, C_in_p), lambda n: (n, 0, 0)),
        pl.BlockSpec((K, C_in_p, C_h_p), lambda n: (0, 0, 0)),
        pl.BlockSpec((1, C_h_p), lambda n: (0, 0)),
        pl.BlockSpec((K, C_h_p, C_out_p), lambda n: (0, 0, 0)),
        pl.BlockSpec((1, C_out_p), lambda n: (0, 0)),
    ]
    operands = [x_pad, w1, b1, w2, b2]
    if has_downsample:
        wd = jnp.zeros((C_in_p, C_out_p), jnp.float32).at[:C_in, :C_out].set(
            jnp.transpose(params["wd"][:, :, 0].astype(jnp.float32), (1, 0))
        ).astype(jnp.bfloat16)
        bd = jnp.zeros((1, C_out_p), jnp.float32).at[0, :C_out].set(
            params["bd"].astype(jnp.float32))
        in_specs += [pl.BlockSpec((C_in_p, C_out_p), lambda n: (0, 0)),
                     pl.BlockSpec((1, C_out_p), lambda n: (0, 0))]
        operands += [wd, bd]

    kernel = functools.partial(_temporal_block_kernel,
                               K=K, dil=dil, pad=pad, pad_buf=pad_buf, L=L,
                               B_t=B_t, has_downsample=has_downsample)

    out_nlc = pl.pallas_call(
        kernel,
        out_shape=jax.ShapeDtypeStruct((N, L, C_out_p), jnp.bfloat16),
        grid_spec=pltpu.PrefetchScalarGridSpec(
            num_scalar_prefetch=0,
            grid=grid,
            in_specs=in_specs,
            out_specs=pl.BlockSpec((B_t, L, C_out_p), lambda n: (n, 0, 0)),
            scratch_shapes=[pltpu.VMEM((B_t, pad_buf + L, C_h_p), jnp.bfloat16)],
        ),
        compiler_params=pltpu.CompilerParams(
            dimension_semantics=("parallel",),
            vmem_limit_bytes=vmem_limit),
    )(*operands)

    # Drop channel padding and go back to PyTorch NCW layout / caller dtype.
    # TODO(synk): in a stacked TCN, hand the bf16 NLC (lane-padded) output
    # straight to the next block to avoid this extra HBM pass.
    return jnp.transpose(out_nlc[:, :, :C_out], (0, 2, 1)).astype(x_ncl.dtype)


# ---------------------------- pure-JAX reference -----------------------------
def _ref_conv1d_chomp(x_ncl, w_oik, b, pad, dil):
    L = x_ncl.shape[-1]
    out = jax.lax.conv_general_dilated(
        x_ncl, w_oik, window_strides=(1,), padding=[(pad, pad)],
        rhs_dilation=(dil,), dimension_numbers=("NCH", "OIH", "NCH"))
    out = out + b[None, :, None]
    return out[:, :, :L]                                             # Chomp1d


def temporal_block_ref(x_ncl, params, *, kernel_size, dilation, padding):
    def wn(v, g):
        nrm = jnp.sqrt(jnp.sum(v * v, axis=(1, 2), keepdims=True))
        return g.reshape(-1, 1, 1) * v / nrm

    h = _ref_conv1d_chomp(x_ncl, wn(params["v1"], params["g1"]), params["b1"],
                          padding, dilation)
    h = jnp.maximum(h, 0.0)                                          # relu1 (+dropout1=id)
    o = _ref_conv1d_chomp(h, wn(params["v2"], params["g2"]), params["b2"],
                          padding, dilation)
    o = jnp.maximum(o, 0.0)                                          # relu2 (+dropout2=id)
    if params.get("wd") is not None:
        res = jax.lax.conv_general_dilated(
            x_ncl, params["wd"], window_strides=(1,), padding=[(0, 0)],
            dimension_numbers=("NCH", "OIH", "NCH")) + params["bd"][None, :, None]
    else:
        res = x_ncl
    return jnp.maximum(o + res, 0.0)


# ------------------------------------ main -----------------------------------
if __name__ == "__main__":
    # Module config (small, matches TemporalBlock.__init__ shapes)
    N, C_in, C_out, L = 2, 4, 8, 16
    kernel_size, stride, dilation = 3, 1, 2
    padding = (kernel_size - 1) * dilation                            # causal padding = 4

    key = jax.random.PRNGKey(0)
    ks = jax.random.split(key, 10)
    params = {
        # conv1 weight_norm params: v (O, I, K), g (O,)
        "v1": 0.1 * jax.random.normal(ks[0], (C_out, C_in, kernel_size), jnp.float32),
        "g1": 1.0 + 0.1 * jax.random.normal(ks[1], (C_out,), jnp.float32),
        "b1": 0.1 * jax.random.normal(ks[2], (C_out,), jnp.float32),
        # conv2 weight_norm params
        "v2": 0.1 * jax.random.normal(ks[3], (C_out, C_out, kernel_size), jnp.float32),
        "g2": 1.0 + 0.1 * jax.random.normal(ks[4], (C_out,), jnp.float32),
        "b2": 0.1 * jax.random.normal(ks[5], (C_out,), jnp.float32),
        # downsample 1x1 conv (present because C_in != C_out)
        "wd": 0.1 * jax.random.normal(ks[6], (C_out, C_in, 1), jnp.float32),
        "bd": 0.1 * jax.random.normal(ks[7], (C_out,), jnp.float32),
    }

    x = jax.random.normal(ks[8], (N, C_in, L), jnp.float32)           # PyTorch NCW layout

    y = temporal_block_pallas(x, params, kernel_size=kernel_size,
                              dilation=dilation, padding=padding)
    y = jax.block_until_ready(y)

    y_ref = temporal_block_ref(x, params, kernel_size=kernel_size,
                               dilation=dilation, padding=padding)
    assert y.shape == (N, C_out, L)
    # bf16 MXU inputs + bf16 kernel output with f32 accumulation -> loose
    # tolerance vs the f32 reference.
    assert jnp.allclose(y, y_ref, atol=5e-2, rtol=5e-2), "mismatch vs reference"

    # TODO(synk): dropout1/dropout2 are implemented as identity (inference mode);
    # training-mode stochastic dropout is not reproduced.
    print("KERNEL_OK")
</pallas_src>

<mosaic_0001>
module attributes {stable_mosaic.version = 11 : i64} {
  func.func @_temporal_block_kernel(%arg0: i32, %arg1: memref<1x32x128xbf16, #tpu.memory_space<vmem>>, %arg2: memref<3x128x128xbf16, #tpu.memory_space<vmem>>, %arg3: memref<1x128xf32, #tpu.memory_space<vmem>>, %arg4: memref<3x128x128xbf16, #tpu.memory_space<vmem>>, %arg5: memref<1x128xf32, #tpu.memory_space<vmem>>, %arg6: memref<128x128xbf16, #tpu.memory_space<vmem>>, %arg7: memref<1x128xf32, #tpu.memory_space<vmem>>, %arg8: memref<1x16x128xbf16, #tpu.memory_space<vmem>>, %arg9: memref<1x32x128xbf16, #tpu.memory_space<vmem>>) attributes {dimension_semantics = [#tpu.dimension_semantics<parallel>], iteration_bounds = array<i64: 2>, scalar_prefetch = 0 : i64, scratch_operands = 1 : i64, tpu.core_type = #tpu.core_type<tc>, window_params = [{transform_indices = @transform_0, window_bounds = array<i64: 1, 32, 128>}, {pipeline_mode = #tpu.pipeline_mode<synchronous>, transform_indices = @transform_1, window_bounds = array<i64: 3, 128, 128>}, {pipeline_mode = #tpu.pipeline_mode<synchronous>, transform_indices = @transform_2, window_bounds = array<i64: 1, 128>}, {pipeline_mode = #tpu.pipeline_mode<synchronous>, transform_indices = @transform_3, window_bounds = array<i64: 3, 128, 128>}, {pipeline_mode = #tpu.pipeline_mode<synchronous>, transform_indices = @transform_4, window_bounds = array<i64: 1, 128>}, {pipeline_mode = #tpu.pipeline_mode<synchronous>, transform_indices = @transform_5, window_bounds = array<i64: 128, 128>}, {pipeline_mode = #tpu.pipeline_mode<synchronous>, transform_indices = @transform_6, window_bounds = array<i64: 1, 128>}, {transform_indices = @transform_7, window_bounds = array<i64: 1, 16, 128>}]} {
    %c0_i32 = arith.constant 0 : i32
    %0 = arith.cmpi eq, %arg0, %c0_i32 : i32
    %1 = arith.extui %0 : i1 to i32
    %c0_i32_0 = arith.constant 0 : i32
    %2 = arith.cmpi ne, %1, %c0_i32_0 : i32
    scf.if %2 {
      %cst_57 = arith.constant 0.000000e+00 : bf16
      %63 = vector.broadcast %cst_57 : bf16 to vector<1x16x128xbf16>
      %c0_58 = arith.constant 0 : index
      %c0_59 = arith.constant 0 : index
      %c0_60 = arith.constant 0 : index
      %64 = vector.load %arg9[%c0_58, %c0_59, %c0_60] : memref<1x32x128xbf16, #tpu.memory_space<vmem>>, vector<1x16x128xbf16>
      tpu.vector_store %arg9[%c0_58, %c0_59, %c0_60], %63 {strides = array<i32>} : memref<1x32x128xbf16, #tpu.memory_space<vmem>>, vector<1x16x128xbf16>,
    } else {
    }
    %c0 = arith.constant 0 : index
    %c12 = arith.constant 12 : index
    %c0_1 = arith.constant 0 : index
    %3 = vector.load %arg1[%c0, %c12, %c0_1] : memref<1x32x128xbf16, #tpu.memory_space<vmem>>, vector<1x16x128xbf16>
    %4 = vector.shape_cast %3 : vector<1x16x128xbf16> to vector<16x128xbf16>
    %c0_2 = arith.constant 0 : index
    %c0_3 = arith.constant 0 : index
    %c0_4 = arith.constant 0 : index
    %5 = vector.load %arg2[%c0_2, %c0_3, %c0_4] : memref<3x128x128xbf16, #tpu.memory_space<vmem>>, vector<1x128x128xbf16>
    %6 = vector.shape_cast %5 : vector<1x128x128xbf16> to vector<128x128xbf16>
    %cst = arith.constant dense<0.000000e+00> : vector<16x128xf32>
    %7 = tpu.matmul %4, %6, %cst {dimension_numbers = #tpu.dot_dimension_numbers<[1], [0], [0], [1], [0, 0, 1, 1], [], []>} : vector<16x128xbf16>, vector<128x128xbf16>, vector<16x128xf32> -> vector<16x128xf32>
    %c0_5 = arith.constant 0 : index
    %c14 = arith.constant 14 : index
    %c0_6 = arith.constant 0 : index
    %8 = vector.load %arg1[%c0_5, %c14, %c0_6] : memref<1x32x128xbf16, #tpu.memory_space<vmem>>, vector<1x16x128xbf16>
    %9 = vector.shape_cast %8 : vector<1x16x128xbf16> to vector<16x128xbf16>
    %c1 = arith.constant 1 : index
    %c0_7 = arith.constant 0 : index
    %c0_8 = arith.constant 0 : index
    %10 = vector.load %arg2[%c1, %c0_7, %c0_8] : memref<3x128x128xbf16, #tpu.memory_space<vmem>>, vector<1x128x128xbf16>
    %11 = vector.shape_cast %10 : vector<1x128x128xbf16> to vector<128x128xbf16>
    %cst_9 = arith.constant dense<0.000000e+00> : vector<16x128xf32>
    %12 = tpu.matmul %9, %11, %cst_9 {dimension_numbers = #tpu.dot_dimension_numbers<[1], [0], [0], [1], [0, 0, 1, 1], [], []>} : vector<16x128xbf16>, vector<128x128xbf16>, vector<16x128xf32> -> vector<16x128xf32>
    %13 = arith.addf %7, %12 : vector<16x128xf32>
    %c0_10 = arith.constant 0 : index
    %c16 = arith.constant 16 : index
    %c0_11 = arith.constant 0 : index
    %14 = vector.load %arg1[%c0_10, %c16, %c0_11] : memref<1x32x128xbf16, #tpu.memory_space<vmem>>, vector<1x16x128xbf16>
    %15 = vector.shape_cast %14 : vector<1x16x128xbf16> to vector<16x128xbf16>
    %c2 = arith.constant 2 : index
    %c0_12 = arith.constant 0 : index
    %c0_13 = arith.constant 0 : index
    %16 = vector.load %arg2[%c2, %c0_12, %c0_13] : memref<3x128x128xbf16, #tpu.memory_space<vmem>>, vector<1x128x128xbf16>
    %17 = vector.shape_cast %16 : vector<1x128x128xbf16> to vector<128x128xbf16>
    %cst_14 = arith.constant dense<0.000000e+00> : vector<16x128xf32>
    %18 = tpu.matmul %15, %17, %cst_14 {dimension_numbers = #tpu.dot_dimension_numbers<[1], [0], [0], [1], [0, 0, 1, 1], [], []>} : vector<16x128xbf16>, vector<128x128xbf16>, vector<16x128xf32> -> vector<16x128xf32>
    %19 = arith.addf %13, %18 : vector<16x128xf32>
    %c0_15 = arith.constant 0 : index
    %c0_16 = arith.constant 0 : index
    %20 = vector.load %arg3[%c0_15, %c0_16] : memref<1x128xf32, #tpu.memory_space<vmem>>, vector<1x128xf32>
    %21 = vector.broadcast %20 : vector<1x128xf32> to vector<16x128xf32>
    %22 = arith.addf %19, %21 : vector<16x128xf32>
    %cst_17 = arith.constant 0.000000e+00 : f32
    %23 = vector.broadcast %cst_17 : f32 to vector<16x128xf32>
    %24 = arith.maximumf %22, %23 : vector<16x128xf32>
    %25 = vector.shape_cast %24 : vector<16x128xf32> to vector<1x16x128xf32>
    %26 = arith.truncf %25 : vector<1x16x128xf32> to vector<1x16x128xbf16>
    %c0_18 = arith.constant 0 : index
    %c16_19 = arith.constant 16 : index
    %c0_20 = arith.constant 0 : index
    %27 = vector.load %arg9[%c0_18, %c16_19, %c0_20] : memref<1x32x128xbf16, #tpu.memory_space<vmem>>, vector<1x16x128xbf16>
    tpu.vector_store %arg9[%c0_18, %c16_19, %c0_20], %26 {strides = array<i32>} : memref<1x32x128xbf16, #tpu.memory_space<vmem>>, vector<1x16x128xbf16>,
    %c0_21 = arith.constant 0 : index
    %c12_22 = arith.constant 12 : index
    %c0_23 = arith.constant 0 : index
    %28 = vector.load %arg9[%c0_21, %c12_22, %c0_23] : memref<1x32x128xbf16, #tpu.memory_space<vmem>>, vector<1x16x128xbf16>
    %29 = vector.shape_cast %28 : vector<1x16x128xbf16> to vector<16x128xbf16>
    %c0_24 = arith.constant 0 : index
    %c0_25 = arith.constant 0 : index
    %c0_26 = arith.constant 0 : index
    %30 = vector.load %arg4[%c0_24, %c0_25, %c0_26] : memref<3x128x128xbf16, #tpu.memory_space<vmem>>, vector<1x128x128xbf16>
    %31 = vector.shape_cast %30 : vector<1x128x128xbf16> to vector<128x128xbf16>
    %cst_27 = arith.constant dense<0.000000e+00> : vector<16x128xf32>
    %32 = tpu.matmul %29, %31, %cst_27 {dimension_numbers = #tpu.dot_dimension_numbers<[1], [0], [0], [1], [0, 0, 1, 1], [], []>} : vector<16x128xbf16>, vector<128x128xbf16>, vector<16x128xf32> -> vector<16x128xf32>
    %c0_28 = arith.constant 0 : index
    %c14_29 = arith.constant 14 : index
    %c0_30 = arith.constant 0 : index
    %33 = vector.load %arg9[%c0_28, %c14_29, %c0_30] : memref<1x32x128xbf16, #tpu.memory_space<vmem>>, vector<1x16x128xbf16>
    %34 = vector.shape_cast %33 : vector<1x16x128xbf16> to vector<16x128xbf16>
    %c1_31 = arith.constant 1 : index
    %c0_32 = arith.constant 0 : index
    %c0_33 = arith.constant 0 : index
    %35 = vector.load %arg4[%c1_31, %c0_32, %c0_33] : memref<3x128x128xbf16, #tpu.memory_space<vmem>>, vector<1x128x128xbf16>
    %36 = vector.shape_cast %35 : vector<1x128x128xbf16> to vector<128x128xbf16>
    %cst_34 = arith.constant dense<0.000000e+00> : vector<16x128xf32>
    %37 = tpu.matmul %34, %36, %cst_34 {dimension_numbers = #tpu.dot_dimension_numbers<[1], [0], [0], [1], [0, 0, 1, 1], [], []>} : vector<16x128xbf16>, vector<128x128xbf16>, vector<16x128xf32> -> vector<16x128xf32>
    %38 = arith.addf %32, %37 : vector<16x128xf32>
    %c0_35 = arith.constant 0 : index
    %c16_36 = arith.constant 16 : index
    %c0_37 = arith.constant 0 : index
    %39 = vector.load %arg9[%c0_35, %c16_36, %c0_37] : memref<1x32x128xbf16, #tpu.memory_space<vmem>>, vector<1x16x128xbf16>
    %40 = vector.shape_cast %39 : vector<1x16x128xbf16> to vector<16x128xbf16>
    %c2_38 = arith.constant 2 : index
    %c0_39 = arith.constant 0 : index
    %c0_40 = arith.constant 0 : index
    %41 = vector.load %arg4[%c2_38, %c0_39, %c0_40] : memref<3x128x128xbf16, #tpu.memory_space<vmem>>, vector<1x128x128xbf16>
    %42 = vector.shape_cast %41 : vector<1x128x128xbf16> to vector<128x128xbf16>
    %cst_41 = arith.constant dense<0.000000e+00> : vector<16x128xf32>
    %43 = tpu.matmul %40, %42, %cst_41 {dimension_numbers = #tpu.dot_dimension_numbers<[1], [0], [0], [1], [0, 0, 1, 1], [], []>} : vector<16x128xbf16>, vector<128x128xbf16>, vector<16x128xf32> -> vector<16x128xf32>
    %44 = arith.addf %38, %43 : vector<16x128xf32>
    %c0_42 = arith.constant 0 : index
    %c0_43 = arith.constant 0 : index
    %45 = vector.load %arg5[%c0_42, %c0_43] : memref<1x128xf32, #tpu.memory_space<vmem>>, vector<1x128xf32>
    %46 = vector.broadcast %45 : vector<1x128xf32> to vector<16x128xf32>
    %47 = arith.addf %44, %46 : vector<16x128xf32>
    %cst_44 = arith.constant 0.000000e+00 : f32
    %48 = vector.broadcast %cst_44 : f32 to vector<16x128xf32>
    %49 = arith.maximumf %47, %48 : vector<16x128xf32>
    %c0_45 = arith.constant 0 : index
    %c16_46 = arith.constant 16 : index
    %c0_47 = arith.constant 0 : index
    %50 = vector.load %arg1[%c0_45, %c16_46, %c0_47] : memref<1x32x128xbf16, #tpu.memory_space<vmem>>, vector<1x16x128xbf16>
    %51 = vector.shape_cast %50 : vector<1x16x128xbf16> to vector<16x128xbf16>
    %c0_48 = arith.constant 0 : index
    %c0_49 = arith.constant 0 : index
    %52 = vector.load %arg6[%c0_48, %c0_49] : memref<128x128xbf16, #tpu.memory_space<vmem>>, vector<128x128xbf16>
    %cst_50 = arith.constant dense<0.000000e+00> : vector<16x128xf32>
    %53 = tpu.matmul %51, %52, %cst_50 {dimension_numbers = #tpu.dot_dimension_numbers<[1], [0], [0], [1], [0, 0, 1, 1], [], []>} : vector<16x128xbf16>, vector<128x128xbf16>, vector<16x128xf32> -> vector<16x128xf32>
    %c0_51 = arith.constant 0 : index
    %c0_52 = arith.constant 0 : index
    %54 = vector.load %arg7[%c0_51, %c0_52] : memref<1x128xf32, #tpu.memory_space<vmem>>, vector<1x128xf32>
    %55 = vector.broadcast %54 : vector<1x128xf32> to vector<16x128xf32>
    %56 = arith.addf %53, %55 : vector<16x128xf32>
    %57 = arith.addf %49, %56 : vector<16x128xf32>
    %cst_53 = arith.constant 0.000000e+00 : f32
    %58 = vector.broadcast %cst_53 : f32 to vector<16x128xf32>
    %59 = arith.maximumf %57, %58 : vector<16x128xf32>
    %60 = vector.shape_cast %59 : vector<16x128xf32> to vector<1x16x128xf32>
    %61 = arith.truncf %60 : vector<1x16x128xf32> to vector<1x16x128xbf16>
    %c0_54 = arith.constant 0 : index
    %c0_55 = arith.constant 0 : index
    %c0_56 = arith.constant 0 : index
    %62 = vector.load %arg8[%c0_54, %c0_55, %c0_56] : memref<1x16x128xbf16, #tpu.memory_space<vmem>>, vector<1x16x128xbf16>
    tpu.vector_store %arg8[%c0_54, %c0_55, %c0_56], %61 {strides = array<i32>} : memref<1x16x128xbf16, #tpu.memory_space<vmem>>, vector<1x16x128xbf16>,
    return
  }
  func.func @transform_0(%arg0: i32) -> (i32, i32, i32) {
    %c0_i32 = arith.constant 0 : i32
    %c0_i32_0 = arith.constant 0 : i32
    %c0_i32_1 = arith.constant 0 : i32
    return %arg0, %c0_i32, %c0_i32_0 : i32, i32, i32
  }
  func.func @transform_1(%arg0: i32) -> (i32, i32, i32) {
    %c0_i32 = arith.constant 0 : i32
    %c0_i32_0 = arith.constant 0 : i32
    %c0_i32_1 = arith.constant 0 : i32
    %c0_i32_2 = arith.constant 0 : i32
    return %c0_i32, %c0_i32_0, %c0_i32_1 : i32, i32, i32
  }
  func.func @transform_2(%arg0: i32) -> (i32, i32) {
    %c0_i32 = arith.constant 0 : i32
    %c0_i32_0 = arith.constant 0 : i32
    %c0_i32_1 = arith.constant 0 : i32
    return %c0_i32, %c0_i32_0 : i32, i32
  }
  func.func @transform_3(%arg0: i32) -> (i32, i32, i32) {
    %c0_i32 = arith.constant 0 : i32
    %c0_i32_0 = arith.constant 0 : i32
    %c0_i32_1 = arith.constant 0 : i32
    %c0_i32_2 = arith.constant 0 : i32
    return %c0_i32, %c0_i32_0, %c0_i32_1 : i32, i32, i32
  }
  func.func @transform_4(%arg0: i32) -> (i32, i32) {
    %c0_i32 = arith.constant 0 : i32
    %c0_i32_0 = arith.constant 0 : i32
    %c0_i32_1 = arith.constant 0 : i32
    return %c0_i32, %c0_i32_0 : i32, i32
  }
  func.func @transform_5(%arg0: i32) -> (i32, i32) {
    %c0_i32 = arith.constant 0 : i32
    %c0_i32_0 = arith.constant 0 : i32
    %c0_i32_1 = arith.constant 0 : i32
    return %c0_i32, %c0_i32_0 : i32, i32
  }
  func.func @transform_6(%arg0: i32) -> (i32, i32) {
    %c0_i32 = arith.constant 0 : i32
    %c0_i32_0 = arith.constant 0 : i32
    %c0_i32_1 = arith.constant 0 : i32
    return %c0_i32, %c0_i32_0 : i32, i32
  }
  func.func @transform_7(%arg0: i32) -> (i32, i32, i32) {
    %c0_i32 = arith.constant 0 : i32
    %c0_i32_0 = arith.constant 0 : i32
    %c0_i32_1 = arith.constant 0 : i32
    return %arg0, %c0_i32, %c0_i32_0 : i32, i32, i32
  }
}

</mosaic_0001>

<bundles_post_ra>
// kernel: tpu_custom_call.1
= control target key start
LH: loop header
LB: loop body
LE: loop exit
PB: predicated region body
PF: predicated region fallthrough
CT: control target
= control target key end

     0   :  { %12 = vsyncpa [#allocation4], 0  ;;  %s2376_s0 = inlined_call_operand.hbm [shape: bf16[2,32,128], index: 0, kind: input, shape index: {}]   ;;  %s2377_s1 = inlined_call_operand.hbm [shape: bf16[3,128,128], index: 1, kind: input, shape index: {}]   ;;  %s2378_s2 = inlined_call_operand.vmem [shape: f32[1,128], index: 2, kind: input, shape index: {}]   ;;  %s2379_s3 = inlined_call_operand.hbm [shape: bf16[3,128,128], index: 3, kind: input, shape index: {}]   ;;  %s2380_s4 = inlined_call_operand.vmem [shape: f32[1,128], index: 4, kind: input, shape index: {}]   ;;  %s2381_s5 = inlined_call_operand.hbm [shape: bf16[128,128], index: 5, kind: input, shape index: {}]   ;;  %s2382_s6 = inlined_call_operand.vmem [shape: f32[1,128], index: 6, kind: input, shape index: {}]   ;;  %s2383_s7 = inlined_call_operand.hbm [shape: bf16[2,16,128], index: 7, kind: output, shape index: {}]  }
   0x1   :  { %14 = vsyncpa [#allocation4 + $0x1], 0 }
   0x2   :  { %15 = vsyncpa [#allocation7], 0 }
   0x3   :  { %16 = vsyncpa [#allocation10], 0 }
   0x4   :  { %17 = vsyncpa [#allocation5], 0 }
   0x5   :  { %19 = vsyncpa [#allocation5 + $0x1], 0  ;;  %s2000_s24 = smov 0   ;;  %s2002_s25 = smov 0  }
   0x6   :  { %s2004_s26 = smov 0   ;;  %s2006_s27 = smov 0  }
   0x7 LB: > { %s2021_s28 = sadd.s32 4294967295, %s1946_s27   ;;  %s1312_s29 = sadd.s32 4294967294, %s1946_s27   ;;  %s1946_s27 = sphi %s2006_s27, %s2410_s27   ;;  %s1942_s26 = sphi %s2004_s26, %s2409_s26   ;;  %s1938_s25 = sphi %s2002_s25, %s2408_s25   ;;  %s1934_s24 = sphi %s2000_s24, %s2407_s24  }
   0x8   : > { %p45_p0 = scmp.ne.s32.totalorder %s1938_s25, %s1934_s24  ;;  %p2384_p1 = scmp.eq.s32.totalorder %s2021_s28, 0 }
   0x9   : > { %p201_p3 = scmp.eq.s32.totalorder %s1312_s29, 1  ;;  %p1313_p5 = scmp.ge.s32.totalorder %s1946_s27, 1 }
   0xa   : > { %p2030_p4 = por %p2384_p1, %p45_p0  ;;  %p208_p7 = scmp.lt.s32.totalorder %s1946_s27, 3 }
   0xb   : > { %p2035_p6 = por %p201_p3, %p45_p0  ;;  %s1948_s10 = smov [#allocation6]  }
   0xc   : > { %s2388_s30 = scalar_select %p2030_p4, 1, 0 }
   0xd   : > { %s2389_s8 = scalar_select %p2035_p6, 1, 0 }
   0xe   : > { %p2041_p9 = pnand %p1313_p5, %p208_p7  ;;  %s220_s11 = sshll.u32 %s1948_s10, 4  ;;  %s2045_s11 = int_to_ptr.vmem [resolvable:$true] %s220_s11 }
   0xf   : > { %2390 = sst [smem:[#allocation16_spill]] %s2389_s8  ;;  %s1949_s13 = smov [#allocation8]  }
  0x10   : > { %s2391_s9 = scalar_select %p2041_p9, 1, 0 }
  0x11   : > { %p1628_p10 = pneg %p2041_p9  ;;  %s236_s14 = sshll.u32 %s1949_s13, 4  ;;  %s2056_s14 = int_to_ptr.vmem [resolvable:$true] %s236_s14 }
  0x12   : > { %s1950_s15 = smov [#allocation9]   ;;  %s1758_s19 = scalar_lea.hbm %s2377_s1, 3072 }
  0x13   : > { %p2052_p12 = pnand %p1628_p10, %p2384_p1  ;;  %s2058_s16 = sshll.u32 %s1950_s15, 4  ;;  %s253_s16 = int_to_ptr.vmem [resolvable:$true] %s2058_s16 }
  0x14   : > { %p1759_p13 = scmp.ne.s32.totalorder %s2377_s1, %s1758_s19  ;;  %p1765_p7 = scmp.lt.u32.totalorder %s1758_s19, %s2377_s1 }
  0x15   : > { %p2068_p0 = pneg %p2052_p12 }
  0x17   : > { %p1761_p3 = pnand %p2068_p0, %p1759_p13 }
  0x19   : > { %p1762_p5 = pneg %p1761_p3 }
  0x1b   : > { %p1767_p10 = pnand %p1765_p7, %p1762_p5 }
  0x1d   : > { %1770 = shalt.err (!%p1767_p10)
}
  0x1e   : > { %s1771_s10 = scalar_lea.vmem %s2045_s11, 3072  ;;  %p1779_p2 = scmp.lt.s32.totalorder %s2045_s11, %s2045_s11 }
  0x1f   : > { %p1772_p11 = scmp.ne.s32.totalorder %s2045_s11, %s1771_s10  ;;  %p1780_p6 = scmp.lt.s32.totalorder %s1771_s10, %s1771_s10 }
  0x21   : > { %p1774_p8 = pnand %p1772_p11, %p2068_p0  ;;  %p1781_p13 = por %p1780_p6, %p1779_p2 }
  0x23   : > { %p1775_p1 = pneg %p1774_p8 }
  0x25   : > { %p1782_p3 = pnand %p1781_p13, %p1775_p1 }
  0x27   : > { %1785 = shalt.err (!%p1782_p3)
}
  0x28   : > { %s1951_s13 = smov 64   ;;  %s1952_s15 = smov 4  }
  0x29   : > { %1631 = dma.hbm_to_vmem [thread:$0]  (!%p2052_p12), %s2377_s1, 3072, %s2045_s11, [#allocation7], %s1951_s13, %s1951_s13, %s1952_s15  }
  0x2a   : > { %s1786_s21 = scalar_lea.hbm %s2379_s3, 3072 }
  0x2b   : > { %p1787_p1 = scmp.ne.s32.totalorder %s2379_s3, %s1786_s21  ;;  %p1793_p8 = scmp.lt.u32.totalorder %s1786_s21, %s2379_s3 }
  0x2d   : > { %p1789_p2 = pnand %p1787_p1, %p2068_p0 }
  0x2f   : > { %p1790_p6 = pneg %p1789_p2 }
  0x31   : > { %p1795_p11 = pnand %p1793_p8, %p1790_p6 }
  0x33   : > { %1798 = shalt.err (!%p1795_p11)
}
  0x34   : > { %s1799_s11 = scalar_lea.vmem %s2056_s14, 3072  ;;  %p1807_p13 = scmp.lt.s32.totalorder %s2056_s14, %s2056_s14 }
  0x35   : > { %p1800_p5 = scmp.ne.s32.totalorder %s2056_s14, %s1799_s11  ;;  %p1808_p3 = scmp.lt.s32.totalorder %s1799_s11, %s1799_s11 }
  0x37   : > { %p1802_p7 = pnand %p1800_p5, %p2068_p0  ;;  %p1809_p1 = por %p1808_p3, %p1807_p13 }
  0x39   : > { %p1803_p10 = pneg %p1802_p7 }
  0x3b   : > { %p1810_p2 = pnand %p1809_p1, %p1803_p10 }
  0x3d   : > { %1813 = shalt.err (!%p1810_p2)
}
  0x3e   : > { %1634 = dma.hbm_to_vmem [thread:$0]  (!%p2052_p12), %s2379_s3, 3072, %s2056_s14, [#allocation7], %s1951_s13, %s1951_s13, %s1952_s15  }
  0x3f   : > { %s1814_s20 = scalar_lea.hbm %s2381_s5, 1024 }
  0x40   : > { %p1815_p6 = scmp.ne.s32.totalorder %s2381_s5, %s1814_s20  ;;  %p1821_p5 = scmp.lt.u32.totalorder %s1814_s20, %s2381_s5 }
  0x42   : > { %p1817_p8 = pnand %p1815_p6, %p2068_p0 }
  0x44   : > { %p1818_p11 = pneg %p1817_p8 }
  0x46   : > { %p1823_p7 = pnand %p1821_p5, %p1818_p11 }
  0x48   : > { %1826 = shalt.err (!%p1823_p7)
}
  0x49   : > { %s1827_s11 = scalar_lea.vmem %s253_s16, 1024  ;;  %p1835_p1 = scmp.lt.s32.totalorder %s253_s16, %s253_s16 }
  0x4a   : > { %p1828_p10 = scmp.ne.s32.totalorder %s253_s16, %s1827_s11  ;;  %p1836_p2 = scmp.lt.s32.totalorder %s1827_s11, %s1827_s11 }
  0x4c   : > { %p1830_p13 = pnand %p1828_p10, %p2068_p0  ;;  %p1837_p4 = por %p1836_p2, %p1835_p1 }
  0x4e   : > { %p1831_p3 = pneg %p1830_p13 }
  0x50   : > { %p1838_p9 = pnand %p1837_p4, %p1831_p3 }
  0x52   : > { %1841 = shalt.err (!%p1838_p9)
}
  0x53   : > { %1637 = dma.hbm_to_vmem [thread:$0]  (!%p2052_p12), %s2381_s5, 1024, %s253_s16, [#allocation10], %s1951_s13, %s1951_s13, %s1952_s15  }
  0x54   : > { %s2141_s22 = sadd.s32 1, %s1946_s27   ;;  %s32_s17 = sadd.s32 1, %s1942_s26 }
  0x55   : > { %s29_s12 = ssub.s32 %s1946_s27, %s2141_s22  ;;  %p39_p9 = scmp.ne.s32.totalorder %s1942_s26, %s1938_s25 }
  0x56   : > { %p30_p4 = scmp.eq.s32.totalorder %s29_s12, 0  ;;  %p40_p0 = scmp.eq.s32.totalorder %s1946_s27, 0 }
  0x57   : > { %p1649_p6 = scmp.lt.s32.totalorder %s1946_s27, 2  ;;  %p2394_p11 = scmp.eq.s32.totalorder %s2021_s28, 1 }
  0x58   : > { %s2151_s18 = scalar_select %p30_p4, %s1942_s26, %s32_s17  }
  0x59   : > { %p41_p8 = por %p40_p0, %p39_p9  ;;  %p2155_p5 = por %p2394_p11, %p39_p9 }
  0x5a   : > { %s269_s20 = sand.u32 1, %s1942_s26   ;;  %s1400_s21 = sshll.u32 %s1946_s27, 8 }
  0x5b   : > { %s1318_s16 = sshll.u32 %s269_s20, 4  ;;  %s2164_s10 = scalar_lea.hbm %s2376_s0, %s1400_s21 }
  0x5c   : > { %s273_s11 = scalar_lea.vmem [#allocation3], %s1318_s16  ;;  %p2166_p12 = pnand %p1649_p6, %p41_p8 }
  0x5d   : > { %s280_s14 = sshll.u32 %s273_s11, 4  ;;  %s2172_s12 = scalar_lea.sflag [#allocation4], %s269_s20  ;;  %s2170_s14 = int_to_ptr.vmem [resolvable:$true] %s280_s14 }
  0x5e   : > { %s1842_s17 = scalar_lea.hbm %s2164_s10, 256  ;;  %p1844_p10 = pneg %p2166_p12 }
  0x5f   : > { %p1843_p7 = scmp.ne.s32.totalorder %s2164_s10, %s1842_s17  ;;  %s1847_s23 = scalar_lea.hbm %s2376_s0, 512 }
  0x60   : > { %p1848_p1 = scmp.lt.u32.totalorder %s2164_s10, %s2376_s0  ;;  %p1849_p2 = scmp.lt.u32.totalorder %s1847_s23, %s1842_s17 }
  0x61   : > { %p1845_p13 = pnand %p1844_p10, %p1843_p7  ;;  %p1851_p9 = scmp.lt.u32.totalorder %s1842_s17, %s2164_s10 }
  0x62   : > { %p1850_p4 = por %p1849_p2, %p1848_p1 }
  0x63   : > { %p1846_p3 = pneg %p1845_p13 }
  0x64   : > { %p1852_p0 = por %p1851_p9, %p1850_p4 }
  0x66   : > { %p1853_p6 = pnand %p1852_p0, %p1846_p3 }
  0x68   : > { %1856 = shalt.err (!%p1853_p6)
}
  0x69   : > { %s1857_s20 = scalar_lea.vmem %s2170_s14, 256  ;;  %s1953_s21 = smov [#allocation3]  }
  0x6a   : > { %p1858_p8 = scmp.ne.s32.totalorder %s2170_s14, %s1857_s20  ;;  %s1862_s16 = sshll.u32 %s1953_s21, 4  ;;  %s1863_s16 = int_to_ptr.vmem [resolvable:$false] %s1862_s16 }
  0x6b   : > { %s1864_s29 = scalar_lea.vmem %s1863_s16, 512  ;;  %p1865_p13 = scmp.lt.s32.totalorder %s2170_s14, %s1863_s16 }
  0x6c   : > { %p1860_p11 = pnand %p1858_p8, %p1844_p10  ;;  %p1866_p1 = scmp.lt.s32.totalorder %s1864_s29, %s1857_s20 }
  0x6e   : > { %p1861_p7 = pneg %p1860_p11  ;;  %p1867_p2 = por %p1866_p1, %p1865_p13 }
  0x70   : > { %p1868_p4 = pnand %p1867_p2, %p1861_p7 }
  0x72   : > { %1871 = shalt.err (!%p1868_p4)
}
  0x73   : > { %1641 = dma.hbm_to_vmem [thread:$0]  (!%p2166_p12), %s2164_s10, 256, %s2170_s14, %s2172_s12, %s1951_s13, %s1951_s13, %s1952_s15  }
  0x74   : > { %p2397_p10 = scmp.ne.s32.totalorder %s2391_s9, 0 }
  0x75   : > { %s2206_s17 = sand.u32 (!%p2397_p10), 1, %s1938_s25   ;;  %p2398_p3 = scmp.ne.s32.totalorder (!%p2397_p10), %s2388_s30, 0 }
  0x76   : > { %292 = sbr.rel (%p2397_p10) target bundleno = 713 (0x2c9), region = 48  ;;  %s1322_s23 = sshll.u32 (!%p2397_p10), %s2206_s17, 4 }
  0x77   : > { %s295_s11 = scalar_lea.sflag (!%p2397_p10), [#allocation4], %s2206_s17  ;;  %s2210_s20 = scalar_lea.vmem (!%p2397_p10), [#allocation3], %s1322_s23 }
  0x7d   : > { %1917 = dma.done.wait (%p2398_p3), %s295_s11, 256  }
  0x7e   : > { %1919 = vsyncadd (%p2398_p3), %s295_s11, 4294967040  ;;  %p2399_p12 = scmp.eq.s32.totalorder %s2021_s28, 0 }
  0x80   : > { %1921 = dma.done.wait (%p2399_p12), [#allocation7], 6144   ;;  %p2400_p9 = pmov %p2399_p12 }
  0x82   : > { %1923 = vsyncadd (%p2400_p9), [#allocation7], 4294961152  ;;  %p2401_p0 = pmov %p2400_p9 }
  0x84   : > { %1925 = dma.done.wait (%p2401_p0), [#allocation10], 1024   ;;  %p2402_p6 = pmov %p2401_p0 }
  0x85   : > { %s1326_s9 = sshll.u32 %s2206_s17, 3  ;;  %p2403_p8 = scmp.ne.s32.totalorder %s2021_s28, 0 }
  0x86   : > { %1927 = vsyncadd (%p2402_p6), [#allocation10], 4294966272  ;;  %s2225_s13 = scalar_lea.vmem [#allocation11], %s1326_s9  ;;  %v1954_v0 = vmov (!%p2403_p8), 0  }
  0x87   : > { %345 = sbr.rel (%p2403_p8) target bundleno = 142 (0x8e), region = 68  ;;  %346 = vst [vmem:[#allocation2] sm:$0xff] (!%p2403_p8), %v1954_v0 }
  0x8e PF: > { %v1696_v1 = vld [vmem:[#allocation6 + $0x40] sm:$0xff]   ;;  %v1955_v2 = vmov 0.0   ;;  %v1698_v4 = vld [vmem:[#allocation6 + $0x48] sm:$0xff]   ;;  %vm1956_vm0 = vmmov 0   ;;  %v1700_v6 = vld [vmem:[#allocation6 + $0x50] sm:$0xff]   ;;  %vm393_vm1 = vcmask 1044480  }
  0x8f   : > { %1472 = vmatprep.subr.bf16.mxu0 %v1955_v2  ;;  %1492 = vmatprep.subr.bf16.mxu1 %v1955_v2  ;;  %v1697_v3 = vld [vmem:[#allocation6] sm:$0xff]   ;;  %v1699_v5 = vld [vmem:[#allocation6 + $0x8] sm:$0xff]   ;;  %v1701_v7 = vld [vmem:[#allocation6 + $0x10] sm:$0xff]   ;;  %vm493_vm2 = vcmask 1045504   ;;  %vm752_vm3 = vcmask 1040384   ;;  %vm848_vm4 = vcmask 1041408  }
  0x90   : > { %1473 = vmatpush3.bf16.msra.mxu0 %v1696_v1  ;;  %1488 = vmatprep.mubr.msk.bf16.mxu0 %vm1956_vm0, %v1955_v2  ;;  %v1702_v8 = vld [vmem:[#allocation6 + $0x58] sm:$0xff]   ;;  %v1704_v10 = vld [vmem:[#allocation6 + $0x60] sm:$0xff]   ;;  %v1706_v12 = vld [vmem:[#allocation6 + $0x68] sm:$0xff]   ;;  %s1403_s21 = sshll.u32 %s2021_s28, 7  ;;  %s1210_s16 = sshll.u32 %s2225_s13, 4  ;;  %s2331_s16 = int_to_ptr.vmem [resolvable:$true] %s1210_s16 }
  0x91   : > { %1493 = vmatpush3.bf16.msra.mxu1 %v1697_v3  ;;  %1474 = vmatprep.subr.bf16.mxu0 %v1955_v2  ;;  %v1703_v9 = vld [vmem:[#allocation6 + $0x18] sm:$0xff]   ;;  %v1705_v11 = vld [vmem:[#allocation6 + $0x20] sm:$0xff]   ;;  %v1707_v13 = vld [vmem:[#allocation6 + $0x28] sm:$0xff]   ;;  %s2329_s11 = scalar_lea.hbm %s2383_s7, %s1403_s21  ;;  %s1872_s9 = scalar_lea.vmem %s2331_s16, 128 }
  0x92   : > { %1494 = vmatprep.subr.bf16.mxu1 %v1955_v2  ;;  %1508 = vmatprep.mubr.msk.bf16.mxu1 %vm1956_vm0, %v1955_v2  ;;  %v2244_v14 = vld [vmem:[%s2210_s20 + $0x8] sm:$0xf]  ;;  %v366_v15 = vld [vmem:[%s2210_s20 + $0x4] sm:$0x8]  ;;  %v587_v39 = vld [vmem:[%s2210_s20 + $0xc] sm:$0xf]  ;;  %p1873_p11 = scmp.ne.s32.totalorder %s2331_s16, %s1872_s9 }
  0x93   : > { %v1713_v16 = vld [vmem:[%s2210_s20 + $0xc] ss:$0 sps:$4 sm:$0x77]   ;;  %v347_v17 = vld [vmem:[%s2210_s20 + $0x4] sm:$0xc]  ;;  %v1328_v20 = vcombine.low %v366_v15, %v2244_v14  ;;  %v1348_v40 = vcombine.low %v2244_v14, %v587_v39  ;;  %s1957_s28 = smov [#allocation11]  }
  0x94   : > { %1475 = vmatpush3.bf16.msra.mxu0 %v1698_v4  ;;  %v1715_v18 = vld [vmem:[%s2210_s20 + $0xc] ss:$0 sps:$4 sm:$0x33]   ;;  %v1708_v19 = vld [vmem:[#allocation6 + $0x70] sm:$0xff]   ;;  %v1338_v22 = vcombine.low %v347_v17, %v2244_v14  ;;  %v395_v26 = vrot.slane %v1713_v16, 3  ;;  %v1716_v29 = vld [vmem:[#allocation6 + $0x80] sm:$0xff]   ;;  %p1874_p7 = pnand %p1873_p11, %p2155_p5 }
  0x95   : > { %1495 = vmatpush3.bf16.msra.mxu1 %v1699_v5  ;;  %1476 = vmatprep.subr.bf16.mxu0 %v1955_v2  ;;  %v1709_v21 = vld [vmem:[#allocation6 + $0x30] sm:$0xff]   ;;  %v1710_v23 = vld [vmem:[#allocation6 + $0x78] sm:$0xff]   ;;  %v394_v25 = vrot.slane %v1328_v20, 3  ;;  %v495_v28 = vrot.slane %v1715_v18, 2  ;;  %v1717_v32 = vld [vmem:[#allocation6 + $0x88] sm:$0xff]   ;;  %s1876_s30 = sshll.u32 %s1957_s28, 4  ;;  %s1877_s30 = int_to_ptr.vmem [resolvable:$false] %s1876_s30 }
  0x96   : > { %1496 = vmatprep.subr.bf16.mxu1 %v1955_v2  ;;  %v1711_v24 = vld [vmem:[#allocation6 + $0x38] sm:$0xff]   ;;  %v494_v27 = vrot.slane %v1338_v22, 2  ;;  %v1718_v33 = vld [vmem:[#allocation6 + $0x90] sm:$0xff]   ;;  %v1720_v35 = vld [vmem:[#allocation6 + $0xa0] sm:$0xff]   ;;  %p1875_p13 = pneg %p1874_p7  ;;  %s1878_s15 = scalar_lea.vmem %s1877_s30, 256 }
  0x97   : > { %v396_v30 = vsel %vm393_vm1, %v394_v25, %v395_v26  ;;  %v1719_v34 = vld [vmem:[#allocation6 + $0x98] sm:$0xff]   ;;  %v1721_v36 = vld [vmem:[#allocation6 + $0xa8] sm:$0xff]   ;;  %v1722_v37 = vld [vmem:[#allocation6 + $0xb0] sm:$0xff]   ;;  %p1879_p1 = scmp.lt.s32.totalorder %s2331_s16, %s1877_s30  ;;  %p1880_p2 = scmp.lt.s32.totalorder %s1878_s15, %s1872_s9 }
  0x98   : > { %1477 = vmatpush3.bf16.msra.mxu0 %v1700_v6  ;;  %v496_v31 = vsel %vm493_vm2, %v494_v27, %v495_v28  ;;  %v1723_v38 = vld [vmem:[#allocation6 + $0xb8] sm:$0xff]   ;;  %v1725_v41 = vld [vmem:[#allocation8 + $0x40] sm:$0xff]   ;;  %v1727_v43 = vld [vmem:[#allocation8 + $0x48] sm:$0xff]  }
  0x99   : > { %1497 = vmatpush3.bf16.msra.mxu1 %v1701_v7  ;;  %1478 = vmatprep.subr.bf16.mxu0 %v1955_v2  ;;  %v1726_v42 = vld [vmem:[#allocation8] sm:$0xff]   ;;  %v1728_v44 = vld [vmem:[#allocation8 + $0x8] sm:$0xff]   ;;  %v1729_v45 = vld [vmem:[#allocation8 + $0x50] sm:$0xff]   ;;  %p1881_p4 = por %p1880_p2, %p1879_p1 }
  0x9a   : > { %1498 = vmatprep.subr.bf16.mxu1 %v1955_v2  ;;  %v1730_v46 = vld [vmem:[#allocation8 + $0x10] sm:$0xff]   ;;  %v1731_v47 = vld [vmem:[#allocation8 + $0x58] sm:$0xff]   ;;  %v1733_v49 = vld [vmem:[#allocation8 + $0x60] sm:$0xff]  }
  0x9b   : > { %v1732_v48 = vld [vmem:[#allocation8 + $0x18] sm:$0xff]   ;;  %v1734_v50 = vld [vmem:[#allocation8 + $0x20] sm:$0xff]   ;;  %v1735_v51 = vld [vmem:[#allocation8 + $0x68] sm:$0xff]   ;;  %p1882_p10 = pnand %p1881_p4, %p1875_p13 }
  0x9c   : > { %1479 = vmatpush3.bf16.msra.mxu0 %v1702_v8  ;;  %v1736_v52 = vld [vmem:[#allocation8 + $0x28] sm:$0xff]   ;;  %v1737_v53 = vld [vmem:[#allocation8 + $0x70] sm:$0xff]   ;;  %v1739_v55 = vld [vmem:[#allocation8 + $0x78] sm:$0xff]  }
  0x9d   : > { %1499 = vmatpush3.bf16.msra.mxu1 %v1703_v9  ;;  %1480 = vmatprep.subr.bf16.mxu0 %v1955_v2  ;;  %v1738_v54 = vld [vmem:[#allocation8 + $0x30] sm:$0xff]   ;;  %v1740_v56 = vld [vmem:[#allocation8 + $0x38] sm:$0xff]   ;;  %v1742_v25 = vld [vmem:[#allocation9] sm:$0xff]  }
  0x9e   : > { %1500 = vmatprep.subr.bf16.mxu1 %v1955_v2  ;;  %v1357_v5 = vld [vmem:[%s2378_s2] ss:$0 sm:$0xff]  ;;  %v731_v16 = vld [vmem:[#allocation2] sm:$0x80]  ;;  %v1743_v28 = vld [vmem:[#allocation8 + $0x88] sm:$0xff]  }
  0x9f   : > { %v713_v17 = vld [vmem:[#allocation2] sm:$0xc0]  ;;  %v753_v18 = vrot.slane %v731_v16, 7 }
  0xa0   : > { %1481 = vmatpush3.bf16.msra.mxu0 %v1704_v10  ;;  %v1754_v39 = vld [vmem:[#allocation9 + $0x30] sm:$0xff]  }
  0xa1   : > { %1501 = vmatpush3.bf16.msra.mxu1 %v1705_v11  ;;  %1482 = vmatprep.subr.bf16.mxu0 %v1955_v2 }
  0xa2   : > { %1502 = vmatprep.subr.bf16.mxu1 %v1955_v2 }
  0xa4   : > { %1483 = vmatpush3.bf16.msra.mxu0 %v1706_v12 }
  0xa5   : > { %1503 = vmatpush3.bf16.msra.mxu1 %v1707_v13  ;;  %1484 = vmatprep.subr.bf16.mxu0 %v1955_v2 }
  0xa6   : > { %1504 = vmatprep.subr.bf16.mxu1 %v1955_v2 }
  0xa8   : > { %1485 = vmatpush3.bf16.msra.mxu0 %v1708_v19  ;;  %v849_v19 = vrot.slane %v713_v17, 6 }
  0xa9   : > { %1505 = vmatpush3.bf16.msra.mxu1 %v1709_v21  ;;  %1486 = vmatprep.subr.bf16.mxu0 %v1955_v2 }
  0xaa   : > { %1506 = vmatprep.subr.bf16.mxu1 %v1955_v2 }
  0xac   : > { %1487 = vmatpush3.bf16.msra.mxu0 %v1710_v23 }
  0xad   : > { %1507 = vmatpush3.bf16.msra.mxu1 %v1711_v24  ;;  %1512 = vmatprep.subr.bf16.mxu0 %v1955_v2  ;;  %v1741_v24 = vld [vmem:[#allocation8 + $0x80] sm:$0xff]  }
  0xae   : > { %1532 = vmatprep.subr.bf16.mxu1 %v1955_v2 }
  0xaf   : > { %1489 = vmatmul.mubr.bf16.vlgmr.msra.gmra.mrb[0].mxu0 %v396_v30  ;;  %v1745_v30 = vld [vmem:[#allocation8 + $0x90] sm:$0xff]  }
  0xb0   : > { %1509 = vmatmul.mubr.bf16.vlgmr.msra.gmra.mrb[0].mxu1 %v496_v31  ;;  %1513 = vmatpush3.bf16.msra.mxu0 %v1716_v29  ;;  %v1744_v29 = vld [vmem:[#allocation9 + $0x8] sm:$0xff]   ;;  %v1746_v31 = vld [vmem:[#allocation9 + $0x10] sm:$0xff]  }
  0xb1   : > { %1514 = vmatprep.subr.bf16.mxu0 %v1955_v2  ;;  %1528 = vmatprep.mubr.msk.bf16.mxu0 %vm1956_vm0, %v1955_v2 }
  0xb2   : > { %1548 = vmatprep.mubr.msk.bf16.mxu1 %vm1956_vm0, %v1955_v2  ;;  %1533 = vmatpush3.bf16.msra.mxu1 %v1725_v41  ;;  %v1756_v41 = vld [vmem:[#allocation9 + $0x38] sm:$0xff]  }
  0xb3   : > { %1534 = vmatprep.subr.bf16.mxu1 %v1955_v2 }
  0xb4   : > { %1515 = vmatpush3.bf16.msra.mxu0 %v1717_v32  ;;  %v1747_v32 = vld [vmem:[#allocation8 + $0x98] sm:$0xff]  }
  0xb5   : > { %1516 = vmatprep.subr.bf16.mxu0 %v1955_v2 }
  0xb6   : > { %1535 = vmatpush3.bf16.msra.mxu1 %v1727_v43 }
  0xb7   : > { %1536 = vmatprep.subr.bf16.mxu1 %v1955_v2 }
  0xb8   : > { %1517 = vmatpush3.bf16.msra.mxu0 %v1718_v33  ;;  %v1748_v33 = vld [vmem:[#allocation9 + $0x18] sm:$0xff]  }
  0xb9   : > { %1518 = vmatprep.subr.bf16.mxu0 %v1955_v2 }
  0xba   : > { %1537 = vmatpush3.bf16.msra.mxu1 %v1729_v45 }
  0xbb   : > { %1538 = vmatprep.subr.bf16.mxu1 %v1955_v2 }
  0xbc   : > { %1519 = vmatpush3.bf16.msra.mxu0 %v1719_v34  ;;  %v1749_v34 = vld [vmem:[#allocation8 + $0xa0] sm:$0xff]  }
  0xbd   : > { %1520 = vmatprep.subr.bf16.mxu0 %v1955_v2 }
  0xbe   : > { %1539 = vmatpush3.bf16.msra.mxu1 %v1731_v47 }
  0xbf   : > { %1540 = vmatprep.subr.bf16.mxu1 %v1955_v2 }
  0xc0   : > { %1521 = vmatpush3.bf16.msra.mxu0 %v1720_v35  ;;  %v1750_v35 = vld [vmem:[#allocation9 + $0x20] sm:$0xff]  }
  0xc1   : > { %1522 = vmatprep.subr.bf16.mxu0 %v1955_v2 }
  0xc2   : > { %1541 = vmatpush3.bf16.msra.mxu1 %v1733_v49 }
  0xc3   : > { %1542 = vmatprep.subr.bf16.mxu1 %v1955_v2 }
  0xc4   : > { %1523 = vmatpush3.bf16.msra.mxu0 %v1721_v36  ;;  %v1751_v36 = vld [vmem:[#allocation8 + $0xa8] sm:$0xff]  }
  0xc5   : > { %1524 = vmatprep.subr.bf16.mxu0 %v1955_v2 }
  0xc6   : > { %1543 = vmatpush3.bf16.msra.mxu1 %v1735_v51 }
  0xc7   : > { %1544 = vmatprep.subr.bf16.mxu1 %v1955_v2 }
  0xc8   : > { %1525 = vmatpush3.bf16.msra.mxu0 %v1722_v37  ;;  %v1752_v37 = vld [vmem:[#allocation9 + $0x28] sm:$0xff]  }
  0xc9   : > { %1526 = vmatprep.subr.bf16.mxu0 %v1955_v2 }
  0xca   : > { %1545 = vmatpush3.bf16.msra.mxu1 %v1737_v53 }
  0xcb   : > { %1546 = vmatprep.subr.bf16.mxu1 %v1955_v2 }
  0xcc   : > { %1527 = vmatpush3.bf16.msra.mxu0 %v1723_v38  ;;  %v1753_v38 = vld [vmem:[#allocation8 + $0xb0] sm:$0xff]  }
  0xcd   : > { %1552 = vmatprep.subr.bf16.mxu0 %v1955_v2 }
  0xce   : > { %1547 = vmatpush3.bf16.msra.mxu1 %v1739_v55 }
  0xcf   : > { %1529 = vmatmul.mubr.bf16.vlgmr.msra.gmra.mrb[4].mxu0 %v1348_v40  ;;  %1572 = vmatprep.subr.bf16.mxu1 %v1955_v2  ;;  %v1755_v40 = vld [vmem:[#allocation8 + $0xb8] sm:$0xff]  }
  0xd0   : > { %1568 = vmatprep.mubr.msk.bf16.mxu0 %vm1956_vm0, %v1955_v2  ;;  %1553 = vmatpush3.bf16.msra.mxu0 %v1726_v42  ;;  %v1757_v42 = vld [vmem:[%s2210_s20 + $0x8] sm:$0xff]   ;;  %s1197_s20 = scalar_lea.sflag [#allocation5], %s2206_s17 }
  0xd1   : > { %1554 = vmatprep.subr.bf16.mxu0 %v1955_v2 }
  0xd4   : > { %1555 = vmatpush3.bf16.msra.mxu0 %v1728_v44 }
  0xd5   : > { %1556 = vmatprep.subr.bf16.mxu0 %v1955_v2 }
  0xd8   : > { %1557 = vmatpush3.bf16.msra.mxu0 %v1730_v46 }
  0xd9   : > { %1558 = vmatprep.subr.bf16.mxu0 %v1955_v2 }
  0xdc   : > { %1559 = vmatpush3.bf16.msra.mxu0 %v1732_v48 }
  0xdd   : > { %1560 = vmatprep.subr.bf16.mxu0 %v1955_v2 }
  0xe0   : > { %1561 = vmatpush3.bf16.msra.mxu0 %v1734_v50 }
  0xe1   : > { %1562 = vmatprep.subr.bf16.mxu0 %v1955_v2 }
  0xe4   : > { %1563 = vmatpush3.bf16.msra.mxu0 %v1736_v52 }
  0xe5   : > { %1564 = vmatprep.subr.bf16.mxu0 %v1955_v2 }
  0xe8   : > { %1565 = vmatpush3.bf16.msra.mxu0 %v1738_v54  ;;  %v1383_v54 = vld [vmem:[%s2382_s6] ss:$0 sm:$0xff] }
  0xe9   : > { %1566 = vmatprep.subr.bf16.mxu0 %v1955_v2 }
  0xec   : > { %1567 = vmatpush3.bf16.msra.mxu0 %v1740_v56 }
  0xed   : > { %1592 = vmatprep.subr.bf16.mxu0 %v1955_v2 }
 0x182   : > { %v480_v57 = vpop.f32.mrb[0].mxu0 }
 0x183   : > { %v580_v58 = vpop.f32.mrb[0].mxu1  ;;  %v1490_v59 = vpop.f32.mrb[1].mxu0 }
 0x184   : > { %v581_v60 = vadd.f32 %v580_v58, %v480_v57  ;;  %v1510_v61 = vpop.f32.mrb[1].mxu1  ;;  %v483_v62 = vpop.f32.mrb[2].mxu0 }
 0x185   : > { %v583_v63 = vpop.f32.mrb[2].mxu1  ;;  %v1491_v0 = vpop.f32.mrb[3].mxu0 }
 0x186   : > { %v584_v1 = vadd.f32 %v583_v63, %v483_v62  ;;  %v1511_v3 = vpop.f32.mrb[3].mxu1 }
 0x1a2   : > { %v691_v4 = vpop.f32.mrb[4].mxu0 }
 0x1a3   : > { %v698_v6 = vadd.f32 %v691_v4, %v581_v60  ;;  %v1530_v7 = vpop.f32.mrb[5].mxu0 }
 0x1a4   : > { %v694_v8 = vpop.f32.mrb[6].mxu0 }
 0x1a5   : > { %v707_v9 = vadd.f32 %v1357_v5, %v698_v6  ;;  %v699_v10 = vadd.f32 %v694_v8, %v584_v1  ;;  %v1531_v11 = vpop.f32.mrb[7].mxu0 }
 0x1a7   : > { %v708_v12 = vadd.f32 %v1357_v5, %v699_v10  ;;  %v709_v13 = vmax.f32 %v707_v9, 0.0 }
 0x1a9   : > { %v710_v14 = vmax.f32 %v708_v12, 0.0 }
 0x1ab   : > { %v2295_v15 = vpack.c.bf16 %v710_v14, %v709_v13 }
 0x1ad   : > { %712 = vst [vmem:[#allocation2 + $0x8] sm:$0xff] %v2295_v15 }
 0x1b4   : > { %v732_v20 = vld [vmem:[#allocation2 + $0x8] sm:$0x7f] }
 0x1b5   : > { %v714_v21 = vld [vmem:[#allocation2 + $0x8] sm:$0x3f]  ;;  %v754_v22 = vrot.slane %v732_v20, 7 }
 0x1b6   : > { %v850_v23 = vrot.slane %v714_v21, 6 }
 0x1b7   : > { %v755_v26 = vsel %vm752_vm3, %v753_v18, %v754_v22 }
 0x1b8   : > { %v851_v27 = vsel %vm848_vm4, %v849_v19, %v850_v23  ;;  %1549 = vmatmul.mubr.bf16.vlgmr.msra.gmra.mrb[4].mxu1 %v755_v26 }
 0x1b9   : > { %1569 = vmatmul.mubr.bf16.vlgmr.msra.gmra.mrb[8].mxu0 %v851_v27  ;;  %1573 = vmatpush3.bf16.msra.mxu1 %v1741_v24 }
 0x1ba   : > { %1593 = vmatpush3.bf16.msra.mxu0 %v1742_v25  ;;  %1574 = vmatprep.subr.bf16.mxu1 %v1955_v2 }
 0x1bb   : > { %1594 = vmatprep.subr.bf16.mxu0 %v1955_v2  ;;  %1588 = vmatprep.mubr.msk.bf16.mxu1 %vm1956_vm0, %v1955_v2 }
 0x1bc   : > { %1608 = vmatprep.mubr.msk.bf16.mxu0 %vm1956_vm0, %v1955_v2 }
 0x1bd   : > { %1575 = vmatpush3.bf16.msra.mxu1 %v1743_v28 }
 0x1be   : > { %1595 = vmatpush3.bf16.msra.mxu0 %v1744_v29  ;;  %1576 = vmatprep.subr.bf16.mxu1 %v1955_v2 }
 0x1bf   : > { %1596 = vmatprep.subr.bf16.mxu0 %v1955_v2 }
 0x1c1   : > { %1577 = vmatpush3.bf16.msra.mxu1 %v1745_v30 }
 0x1c2   : > { %1597 = vmatpush3.bf16.msra.mxu0 %v1746_v31  ;;  %1578 = vmatprep.subr.bf16.mxu1 %v1955_v2 }
 0x1c3   : > { %1598 = vmatprep.subr.bf16.mxu0 %v1955_v2 }
 0x1c5   : > { %1579 = vmatpush3.bf16.msra.mxu1 %v1747_v32 }
 0x1c6   : > { %1599 = vmatpush3.bf16.msra.mxu0 %v1748_v33  ;;  %1580 = vmatprep.subr.bf16.mxu1 %v1955_v2 }
 0x1c7   : > { %1600 = vmatprep.subr.bf16.mxu0 %v1955_v2 }
 0x1c9   : > { %1581 = vmatpush3.bf16.msra.mxu1 %v1749_v34 }
 0x1ca   : > { %1601 = vmatpush3.bf16.msra.mxu0 %v1750_v35  ;;  %1582 = vmatprep.subr.bf16.mxu1 %v1955_v2 }
 0x1cb   : > { %1602 = vmatprep.subr.bf16.mxu0 %v1955_v2 }
 0x1cd   : > { %1583 = vmatpush3.bf16.msra.mxu1 %v1751_v36 }
 0x1ce   : > { %1603 = vmatpush3.bf16.msra.mxu0 %v1752_v37  ;;  %1584 = vmatprep.subr.bf16.mxu1 %v1955_v2 }
 0x1cf   : > { %1604 = vmatprep.subr.bf16.mxu0 %v1955_v2 }
 0x1d1   : > { %1585 = vmatpush3.bf16.msra.mxu1 %v1753_v38 }
 0x1d2   : > { %1605 = vmatpush3.bf16.msra.mxu0 %v1754_v39  ;;  %1586 = vmatprep.subr.bf16.mxu1 %v1955_v2 }
 0x1d3   : > { %1606 = vmatprep.subr.bf16.mxu0 %v1955_v2  ;;  %v1382_v2 = vld [vmem:[%s2380_s4] ss:$0 sm:$0xff] }
 0x1d5   : > { %1587 = vmatpush3.bf16.msra.mxu1 %v1755_v40 }
 0x1d6   : > { %1607 = vmatpush3.bf16.msra.mxu0 %v1756_v41 }
 0x1d8   : > { %1589 = vmatmul.mubr.bf16.vlgmr.msra.gmra.mrb[8].mxu1 %v2295_v15 }
 0x1d9   : > { %1609 = vmatmul.mubr.bf16.vlgmr.msra.gmra.mrb[12].mxu0 %v1757_v42 }
 0x28b   : > { %v839_v43 = vpop.f32.mrb[4].mxu1 }
 0x28c   : > { %v935_v44 = vpop.f32.mrb[8].mxu0  ;;  %v1550_v46 = vpop.f32.mrb[5].mxu1 }
 0x28d   : > { %v936_v45 = vadd.f32 %v935_v44, %v839_v43  ;;  %v1570_v47 = vpop.f32.mrb[9].mxu0  ;;  %v842_v48 = vpop.f32.mrb[6].mxu1 }
 0x28e   : > { %v938_v49 = vpop.f32.mrb[10].mxu0  ;;  %v1551_v51 = vpop.f32.mrb[7].mxu1 }
 0x28f   : > { %v939_v50 = vadd.f32 %v938_v49, %v842_v48  ;;  %v1571_v52 = vpop.f32.mrb[11].mxu0 }
 0x2ab   : > { %v1042_v53 = vpop.f32.mrb[8].mxu1 }
 0x2ac   : > { %v1175_v55 = vpop.f32.mrb[12].mxu0  ;;  %v1049_v56 = vadd.f32 %v1042_v53, %v936_v45  ;;  %v1590_v57 = vpop.f32.mrb[9].mxu1 }
 0x2ad   : > { %v1610_v58 = vpop.f32.mrb[13].mxu0  ;;  %v1045_v59 = vpop.f32.mrb[10].mxu1  ;;  %v1176_v62 = vadd.f32 %v1383_v54, %v1175_v55 }
 0x2ae   : > { %v1178_v60 = vpop.f32.mrb[14].mxu0  ;;  %v1058_v61 = vadd.f32 %v1382_v2, %v1049_v56  ;;  %v1050_v63 = vadd.f32 %v1045_v59, %v939_v50  ;;  %v1591_v0 = vpop.f32.mrb[11].mxu1 }
 0x2af   : > { %v1611_v1 = vpop.f32.mrb[15].mxu0  ;;  %v1179_v7 = vadd.f32 %v1383_v54, %v1178_v60 }
 0x2b0   : > { %v1060_v3 = vmax.f32 %v1058_v61, 0.0  ;;  %v1059_v4 = vadd.f32 %v1382_v2, %v1050_v63 }
 0x2b2   : > { %v1182_v5 = vadd.f32 %v1176_v62, %v1060_v3  ;;  %v1061_v6 = vmax.f32 %v1059_v4, 0.0 }
 0x2b4   : > { %v1183_v8 = vadd.f32 %v1179_v7, %v1061_v6  ;;  %v1184_v9 = vmax.f32 %v1182_v5, 0.0 }
 0x2b6   : > { %v1185_v10 = vmax.f32 %v1183_v8, 0.0 }
 0x2b8   : > { %v1407_v11 = vpack.c.bf16 %v1185_v10, %v1184_v9 }
 0x2ba   : > { %1408 = vst [vmem:[%s2225_s13] sm:$0xff] %v1407_v11  }
 0x2bb   : > { %1885 = shalt.err (!%p1882_p10)
}
 0x2bc   : > { %s1886_s13 = scalar_lea.hbm %s2329_s11, 128  ;;  %s1890_s8 = scalar_lea.hbm %s2383_s7, 256 }
 0x2bd   : > { %p1887_p3 = scmp.ne.s32.totalorder %s2329_s11, %s1886_s13  ;;  %p1891_p0 = scmp.lt.u32.totalorder %s2329_s11, %s2383_s7 }
 0x2be   : > { %p1892_p6 = scmp.lt.u32.totalorder %s1890_s8, %s1886_s13  ;;  %p1894_p11 = scmp.lt.u32.totalorder %s1886_s13, %s2329_s11 }
 0x2bf   : > { %p1888_p12 = pnand %p1887_p3, %p2155_p5 }
 0x2c0   : > { %p1893_p8 = por %p1892_p6, %p1891_p0 }
 0x2c1   : > { %p1889_p9 = pneg %p1888_p12 }
 0x2c2   : > { %p1895_p7 = por %p1894_p11, %p1893_p8 }
 0x2c4   : > { %p1896_p13 = pnand %p1895_p7, %p1889_p9 }
 0x2c6   : > { %1899 = shalt.err (!%p1896_p13)
}
 0x2c7   : > { %s1958_s29 = smov 64   ;;  %s1959_s23 = smov 4  }
 0x2c8   : > { %1626 = dma.vmem_to_hbm [thread:$0]  (%p2155_p5), %s2331_s16, 128, %s2329_s11, %s1197_s20, %s1958_s29, %s1958_s29, %s1959_s23  }
 0x2c9 PF: > { %s2404_s9 = sld [smem:[#allocation16_spill]]  ;;  %s1225_s28 = sand.u32 1, %s1934_s24  }
 0x2ca   : > { %p2406_p2 = scmp.ge.s32.totalorder %s1946_s27, 2  ;;  %s1226_s30 = scalar_lea.sflag [#allocation5], %s1225_s28 }
 0x2cf   : > { %p2405_p1 = scmp.ne.s32.totalorder %s2404_s9, 0 }
 0x2d1   : > { %p1643_p4 = pnand %p2406_p2, %p2405_p1 }
 0x2d3   : > { %1929 = dma.done.wait (!%p1643_p4), %s1226_s30, 128  }
 0x2d4   : > { %1931 = vsyncadd (!%p1643_p4), %s1226_s30, 4294967168  ;;  %p22_p10 = scmp.ge.s32.totalorder %s2141_s22, 4   ;;  %s2407_s24 = smov %s1938_s25 }
 0x2d5   : > { %s2408_s25 = smov %s1942_s26  ;;  %s2409_s26 = smov %s2151_s18 }
 0x2d6   : > { %s2410_s27 = smov %s2141_s22  ;;  %24 = sbr.rel (!%p22_p10) target bundleno = 7 (0x7), region = 113 }
 0x2dd   :  { %1231 = vsyncpa [#allocation4], 1 }
 0x2de   :  { %1233 = vsyncpa [#allocation4 + $0x1], 1 }
 0x2df   :  { %1234 = vsyncpa [#allocation7], 1 }
 0x2e0   :  { %1235 = vsyncpa [#allocation10], 1 }
 0x2e1   :  { %1236 = vsyncpa [#allocation5], 1 }
 0x2e2   :  { %1238 = vsyncpa [#allocation5 + $0x1], 1 }

</bundles_post_ra>
